<compile_context>
chip_gen: v7x
topology: tpu7x:2x2x1
jax: 0.10.0
libtpu: 0.0.40
codegen_flags: <defaults>
</compile_context>

<pallas_src>
import functools

import jax
import jax.numpy as jnp
from jax.experimental import pallas as pl
from jax.experimental.pallas import tpu as pltpu

_HPAD = 128    # padded hidden widths (100 -> 128, 50 -> 128)
_CPAD = 128    # padded class width (num_cls -> 128) for a lane-dense output
_MASK = -1e30  # fill for padded class lanes (ignored by max / logsumexp)


def _round_up(x, m):
    return ((x + m - 1) // m) * m


def _mlp_kernel(x_ref, w0_ref, w12_ref, b_ref, out_ref, *, num_cls):
    # x_ref:   [TB, F_pad]     bf16  (batch tile, zero-padded features)
    # w0_ref:  [F_pad, 128]    bf16  (fc0 weight, pre-transposed + padded)
    # w12_ref: [2, 128, 128]   bf16  (fc1 / fc2 weights, stacked)
    # b_ref:   [3, 128]        f32   (fc0 / fc1 / fc2 biases, stacked + padded)
    # out_ref: [TB, 128]       f32   (lane-dense log-probs; sliced in wrapper)
    b = b_ref[...]

    h = jnp.dot(x_ref[...], w0_ref[...], preferred_element_type=jnp.float32)
    h = jnp.maximum(h + b[0:1, :], 0.0)

    h = jnp.dot(h.astype(jnp.bfloat16), w12_ref[0],
                preferred_element_type=jnp.float32)
    h = jnp.maximum(h + b[1:2, :], 0.0)

    logits = jnp.dot(h.astype(jnp.bfloat16), w12_ref[1],
                     preferred_element_type=jnp.float32)
    logits = jnp.maximum(logits + b[2:3, :], 0.0)   # ReLU precedes log_softmax

    # Keep padded class lanes out of max / logsumexp.
    lane = jax.lax.broadcasted_iota(jnp.int32, logits.shape, 1)
    logits = jnp.where(lane < num_cls, logits, _MASK)

    m = jnp.max(logits, axis=-1, keepdims=True)
    s = logits - m
    lse = jnp.log(jnp.sum(jnp.exp(s), axis=-1, keepdims=True))
    out_ref[...] = (s - lse).astype(out_ref.dtype)


def init_modelab_params(key, image_size, num_cls=10):
    """PyTorch-layout (out, in) weights + (out,) biases for ModelAB."""
    dims = [(100, image_size), (50, 100), (num_cls, 50)]
    keys = jax.random.split(key, 2 * len(dims))
    params = {}
    for i, (fo, fi) in enumerate(dims):
        bw = jnp.sqrt(6.0 / (fi + fo))  # xavier_uniform (init_xavier)
        params[f"w{i}"] = jax.random.uniform(keys[2 * i], (fo, fi),
                                             jnp.float32, -bw, bw)
        bb = 1.0 / jnp.sqrt(jnp.float32(fi))
        params[f"b{i}"] = jax.random.uniform(keys[2 * i + 1], (fo,),
                                             jnp.float32, -bb, bb)
    return params


def pack_params(params, image_size, num_cls):
    """One-time prep (outside the jitted forward): transpose, zero-pad to
    lane-dense shapes, cast weights to bf16, stack small tensors."""
    f_pad = _round_up(image_size, 128)

    w0 = jnp.zeros((f_pad, _HPAD), jnp.float32)
    w0 = w0.at[:image_size, :100].set(params["w0"].T)

    w1 = jnp.zeros((_HPAD, _HPAD), jnp.float32)
    w1 = w1.at[:100, :50].set(params["w1"].T)
    w2 = jnp.zeros((_HPAD, _CPAD), jnp.float32)
    w2 = w2.at[:50, :num_cls].set(params["w2"].T)

    b = jnp.zeros((3, _CPAD), jnp.float32)
    b = b.at[0, :100].set(params["b0"])
    b = b.at[1, :50].set(params["b1"])
    b = b.at[2, :num_cls].set(params["b2"])

    return {
        "w0": w0.astype(jnp.bfloat16),
        "w12": jnp.stack([w1, w2]).astype(jnp.bfloat16),
        "b": b,
    }


@functools.partial(jax.jit, static_argnames=("image_size", "num_cls"))
def modelab_forward(x, packed, *, image_size, num_cls):
    xb = x.reshape(-1, image_size)
    batch = xb.shape[0]
    f_pad = packed["w0"].shape[0]

    # Batch tile: as big as reasonable, rounded to sublane multiple of 8.
    tb = min(512, _round_up(batch, 8))
    b_pad = _round_up(batch, tb)

    xp = jnp.zeros((b_pad, f_pad), jnp.bfloat16)
    xp = xp.at[:batch, :image_size].set(xb.astype(jnp.bfloat16))

    kernel = functools.partial(_mlp_kernel, num_cls=num_cls)
    out = pl.pallas_call(
        kernel,
        out_shape=jax.ShapeDtypeStruct((b_pad, _CPAD), jnp.float32),
        grid=(b_pad // tb,),
        in_specs=[
            pl.BlockSpec((tb, f_pad), lambda i: (i, 0)),        # x tile
            pl.BlockSpec((f_pad, _HPAD), lambda i: (0, 0)),     # w0 (resident)
            pl.BlockSpec((2, _HPAD, _CPAD), lambda i: (0, 0, 0)),  # w1,w2
            pl.BlockSpec((3, _CPAD), lambda i: (0, 0)),         # biases
        ],
        out_specs=pl.BlockSpec((tb, _CPAD), lambda i: (i, 0)),
        compiler_params=pltpu.CompilerParams(
            dimension_semantics=("parallel",)),
    )(xp, packed["w0"], packed["w12"], packed["b"])

    return out[:batch, :num_cls]


if __name__ == "__main__":
    key = jax.random.PRNGKey(0)
    k_x, k_p = jax.random.split(key)

    # Small NCHW-style input [B, C, H, W] = [8, 1, 8, 8] -> image_size = 64.
    B, C, H, W = 8, 1, 8, 8
    image_size = C * H * W
    num_cls = 10

    x = jax.random.normal(k_x, (B, C, H, W), jnp.float32)
    params = init_modelab_params(k_p, image_size, num_cls)
    packed = pack_params(params, image_size, num_cls)

    out = modelab_forward(x, packed, image_size=image_size, num_cls=num_cls)
    out = jax.block_until_ready(out)

    # Pure-JAX f32 reference of ModelAB.forward.
    xb = x.reshape(-1, image_size)
    h = jnp.maximum(xb @ params["w0"].T + params["b0"], 0.0)
    h = jnp.maximum(h @ params["w1"].T + params["b1"], 0.0)
    h = jnp.maximum(h @ params["w2"].T + params["b2"], 0.0)
    ref = jax.nn.log_softmax(h, axis=-1)

    assert out.shape == (B, num_cls)
    # Rows of log_softmax must exponentiate-sum to 1.
    assert jnp.allclose(jnp.sum(jnp.exp(out), axis=-1), 1.0, atol=1e-4)
    # Loose tolerance: bf16 MXU feed with f32 accumulation.
    assert jnp.max(jnp.abs(out - ref)) < 1e-1, float(jnp.max(jnp.abs(out - ref)))
    print("KERNEL_OK")
</pallas_src>

<mosaic_0001>
module attributes {stable_mosaic.version = 11 : i64} {
  func.func @_mlp_kernel(%arg0: i32, %arg1: memref<8x128xbf16, #tpu.memory_space<vmem>>, %arg2: memref<128x128xbf16, #tpu.memory_space<vmem>>, %arg3: memref<2x128x128xbf16, #tpu.memory_space<vmem>>, %arg4: memref<3x128xf32, #tpu.memory_space<vmem>>, %arg5: memref<8x128xf32, #tpu.memory_space<vmem>>) attributes {dimension_semantics = [#tpu.dimension_semantics<parallel>], iteration_bounds = array<i64: 1>, scalar_prefetch = 0 : i64, scratch_operands = 0 : i64, tpu.core_type = #tpu.core_type<tc>, window_params = [{transform_indices = @transform_0, window_bounds = array<i64: 8, 128>}, {pipeline_mode = #tpu.pipeline_mode<synchronous>, transform_indices = @transform_1, window_bounds = array<i64: 128, 128>}, {pipeline_mode = #tpu.pipeline_mode<synchronous>, transform_indices = @transform_2, window_bounds = array<i64: 2, 128, 128>}, {pipeline_mode = #tpu.pipeline_mode<synchronous>, transform_indices = @transform_3, window_bounds = array<i64: 3, 128>}, {transform_indices = @transform_4, window_bounds = array<i64: 8, 128>}]} {
    %c0 = arith.constant 0 : index
    %c0_0 = arith.constant 0 : index
    %0 = vector.load %arg4[%c0, %c0_0] : memref<3x128xf32, #tpu.memory_space<vmem>>, vector<3x128xf32>
    %c0_1 = arith.constant 0 : index
    %c0_2 = arith.constant 0 : index
    %1 = vector.load %arg1[%c0_1, %c0_2] : memref<8x128xbf16, #tpu.memory_space<vmem>>, vector<8x128xbf16>
    %c0_3 = arith.constant 0 : index
    %c0_4 = arith.constant 0 : index
    %2 = vector.load %arg2[%c0_3, %c0_4] : memref<128x128xbf16, #tpu.memory_space<vmem>>, vector<128x128xbf16>
    %cst = arith.constant dense<0.000000e+00> : vector<8x128xf32>
    %3 = tpu.matmul %1, %2, %cst {dimension_numbers = #tpu.dot_dimension_numbers<[1], [0], [0], [1], [0, 0, 1, 1], [], []>} : vector<8x128xbf16>, vector<128x128xbf16>, vector<8x128xf32> -> vector<8x128xf32>
    %4 = vector.extract_strided_slice %0 {offsets = [0, 0], sizes = [1, 128], strides = [1, 1]} : vector<3x128xf32> to vector<1x128xf32>
    %5 = vector.broadcast %4 : vector<1x128xf32> to vector<8x128xf32>
    %6 = arith.addf %3, %5 : vector<8x128xf32>
    %cst_5 = arith.constant 0.000000e+00 : f32
    %7 = vector.broadcast %cst_5 : f32 to vector<8x128xf32>
    %8 = arith.maximumf %6, %7 : vector<8x128xf32>
    %9 = arith.truncf %8 : vector<8x128xf32> to vector<8x128xbf16>
    %c0_6 = arith.constant 0 : index
    %c0_7 = arith.constant 0 : index
    %c0_8 = arith.constant 0 : index
    %10 = vector.load %arg3[%c0_6, %c0_7, %c0_8] : memref<2x128x128xbf16, #tpu.memory_space<vmem>>, vector<1x128x128xbf16>
    %11 = vector.shape_cast %10 : vector<1x128x128xbf16> to vector<128x128xbf16>
    %cst_9 = arith.constant dense<0.000000e+00> : vector<8x128xf32>
    %12 = tpu.matmul %9, %11, %cst_9 {dimension_numbers = #tpu.dot_dimension_numbers<[1], [0], [0], [1], [0, 0, 1, 1], [], []>} : vector<8x128xbf16>, vector<128x128xbf16>, vector<8x128xf32> -> vector<8x128xf32>
    %13 = vector.extract_strided_slice %0 {offsets = [1, 0], sizes = [1, 128], strides = [1, 1]} : vector<3x128xf32> to vector<1x128xf32>
    %14 = vector.broadcast %13 : vector<1x128xf32> to vector<8x128xf32>
    %15 = arith.addf %12, %14 : vector<8x128xf32>
    %cst_10 = arith.constant 0.000000e+00 : f32
    %16 = vector.broadcast %cst_10 : f32 to vector<8x128xf32>
    %17 = arith.maximumf %15, %16 : vector<8x128xf32>
    %18 = arith.truncf %17 : vector<8x128xf32> to vector<8x128xbf16>
    %c1 = arith.constant 1 : index
    %c0_11 = arith.constant 0 : index
    %c0_12 = arith.constant 0 : index
    %19 = vector.load %arg3[%c1, %c0_11, %c0_12] : memref<2x128x128xbf16, #tpu.memory_space<vmem>>, vector<1x128x128xbf16>
    %20 = vector.shape_cast %19 : vector<1x128x128xbf16> to vector<128x128xbf16>
    %cst_13 = arith.constant dense<0.000000e+00> : vector<8x128xf32>
    %21 = tpu.matmul %18, %20, %cst_13 {dimension_numbers = #tpu.dot_dimension_numbers<[1], [0], [0], [1], [0, 0, 1, 1], [], []>} : vector<8x128xbf16>, vector<128x128xbf16>, vector<8x128xf32> -> vector<8x128xf32>
    %22 = vector.extract_strided_slice %0 {offsets = [2, 0], sizes = [1, 128], strides = [1, 1]} : vector<3x128xf32> to vector<1x128xf32>
    %23 = vector.broadcast %22 : vector<1x128xf32> to vector<8x128xf32>
    %24 = arith.addf %21, %23 : vector<8x128xf32>
    %cst_14 = arith.constant 0.000000e+00 : f32
    %25 = vector.broadcast %cst_14 : f32 to vector<8x128xf32>
    %26 = arith.maximumf %24, %25 : vector<8x128xf32>
    %27 = tpu.iota {dimensions = array<i32: 1>} : vector<8x128xi32>
    %c10_i32 = arith.constant 10 : i32
    %28 = vector.broadcast %c10_i32 : i32 to vector<8x128xi32>
    %29 = arith.cmpi slt, %27, %28 : vector<8x128xi32>
    %cst_15 = arith.constant -1.000000e+30 : f32
    %30 = vector.broadcast %cst_15 : f32 to vector<8x128xf32>
    %31 = arith.select %29, %26, %30 : vector<8x128xi1>, vector<8x128xf32>
    %cst_16 = arith.constant dense<0xFF800000> : vector<8xf32>
    %32 = vector.multi_reduction <maximumf>, %31, %cst_16 [1] : vector<8x128xf32> to vector<8xf32>
    %33 = vector.shape_cast %32 : vector<8xf32> to vector<8x1xf32>
    %34 = vector.broadcast %33 : vector<8x1xf32> to vector<8x128xf32>
    %35 = arith.subf %31, %34 : vector<8x128xf32>
    %36 = math.exp %35 : vector<8x128xf32>
    %cst_17 = arith.constant dense<0.000000e+00> : vector<8xf32>
    %37 = vector.multi_reduction <add>, %36, %cst_17 [1] : vector<8x128xf32> to vector<8xf32>
    %38 = vector.shape_cast %37 : vector<8xf32> to vector<8x1xf32>
    %39 = math.log %38 : vector<8x1xf32>
    %40 = vector.broadcast %39 : vector<8x1xf32> to vector<8x128xf32>
    %41 = arith.subf %35, %40 : vector<8x128xf32>
    %c0_18 = arith.constant 0 : index
    %c0_19 = arith.constant 0 : index
    %42 = vector.load %arg5[%c0_18, %c0_19] : memref<8x128xf32, #tpu.memory_space<vmem>>, vector<8x128xf32>
    tpu.vector_store %arg5[%c0_18, %c0_19], %41 {strides = array<i32>} : memref<8x128xf32, #tpu.memory_space<vmem>>, vector<8x128xf32>,
    return
  }
  func.func @transform_0(%arg0: i32) -> (i32, i32) {
    %c0_i32 = arith.constant 0 : i32
    %c0_i32_0 = arith.constant 0 : i32
    return %arg0, %c0_i32 : i32, i32
  }
  func.func @transform_1(%arg0: i32) -> (i32, i32) {
    %c0_i32 = arith.constant 0 : i32
    %c0_i32_0 = arith.constant 0 : i32
    %c0_i32_1 = arith.constant 0 : i32
    return %c0_i32, %c0_i32_0 : i32, i32
  }
  func.func @transform_2(%arg0: i32) -> (i32, i32, i32) {
    %c0_i32 = arith.constant 0 : i32
    %c0_i32_0 = arith.constant 0 : i32
    %c0_i32_1 = arith.constant 0 : i32
    %c0_i32_2 = arith.constant 0 : i32
    return %c0_i32, %c0_i32_0, %c0_i32_1 : i32, i32, i32
  }
  func.func @transform_3(%arg0: i32) -> (i32, i32) {
    %c0_i32 = arith.constant 0 : i32
    %c0_i32_0 = arith.constant 0 : i32
    %c0_i32_1 = arith.constant 0 : i32
    return %c0_i32, %c0_i32_0 : i32, i32
  }
  func.func @transform_4(%arg0: i32) -> (i32, i32) {
    %c0_i32 = arith.constant 0 : i32
    %c0_i32_0 = arith.constant 0 : i32
    return %arg0, %c0_i32 : i32, i32
  }
}

</mosaic_0001>

<bundles_post_ra>
// kernel: modelab_forward.1
= control target key start
LH: loop header
LB: loop body
LE: loop exit
PB: predicated region body
PF: predicated region fallthrough
CT: control target
= control target key end

     0   :  { %9 = vsyncpa [#allocation3], 0  ;;  %s743_s0 = inlined_call_operand.vmem [shape: bf16[8,128], index: 0, kind: input, shape index: {}]   ;;  %s744_s1 = inlined_call_operand.hbm [shape: bf16[128,128], index: 1, kind: input, shape index: {}]   ;;  %s745_s2 = inlined_call_operand.vmem [shape: bf16[2,128,128], index: 2, kind: input, shape index: {}]   ;;  %s746_s3 = inlined_call_operand.vmem [shape: f32[3,128], index: 3, kind: input, shape index: {}]   ;;  %s747_s4 = inlined_call_operand.hbm [shape: f32[8,128], index: 4, kind: output, shape index: {}]  }
   0x1   :  { %10 = vsyncpa [#allocation4], 0  ;;  %s604_s15 = smov [#allocation2]   ;;  %s556_s19 = scalar_lea.hbm %s744_s1, 1024 }
   0x2   :  { %s18_s16 = sshll.u32 %s604_s15, 4  ;;  %p557_p0 = scmp.ne.s32.totalorder %s744_s1, %s556_s19  ;;  %s19_s16 = int_to_ptr.vmem [resolvable:$true] %s18_s16 }
   0x3   :  { %p560_p1 = scmp.lt.u32.totalorder %s556_s19, %s744_s1 }
   0x5   :  { %p562_p2 = pnand %p560_p1, %p557_p0 }
   0x7   :  { %565 = shalt.err (!%p562_p2)
}
   0x8   :  { %s566_s24 = scalar_lea.vmem %s19_s16, 1024  ;;  %p571_p4 = scmp.lt.s32.totalorder %s19_s16, %s19_s16 }
   0x9   :  { %p567_p3 = scmp.ne.s32.totalorder %s19_s16, %s566_s24  ;;  %p572_p5 = scmp.lt.s32.totalorder %s566_s24, %s566_s24 }
   0xb   :  { %p573_p6 = por %p572_p5, %p571_p4 }
   0xd   :  { %p574_p7 = pnand %p573_p6, %p567_p3 }
   0xf   :  { %577 = shalt.err (!%p574_p7)
}
  0x10   :  { %s605_s25 = smov 64   ;;  %s606_s26 = smov 4  }
  0x11   :  { %24 = dma.hbm_to_vmem [thread:$0]  %s744_s1, 1024, %s19_s16, [#allocation3], %s605_s25, %s605_s25, %s606_s26  }
  0x12   :  { %600 = dma.done.wait [#allocation3], 1024  }
  0x13   :  { %601 = vsyncadd [#allocation3], 4294966272  ;;  %v607_v0 = vmov 0.0   ;;  %vm608_vm0 = vmmov 0   ;;  %v528_v1 = vld [vmem:[#allocation2] sm:$0xff]   ;;  %v529_v2 = vld [vmem:[#allocation2 + $0x8] sm:$0xff]   ;;  %v51_v24 = vlaneseq }
  0x14   :  { %462 = vmatprep.subr.bf16.mxu0 %v607_v0  ;;  %478 = vmatprep.mubr.msk.bf16.mxu0 %vm608_vm0, %v607_v0  ;;  %v530_v3 = vld [vmem:[#allocation2 + $0x10] sm:$0xff]   ;;  %v536_v4 = vld [vmem:[%s745_s2] sm:$0xff]   ;;  %v531_v5 = vld [vmem:[#allocation2 + $0x18] sm:$0xff]  }
  0x15   :  { %482 = vmatprep.subr.bf16.mxu1 %v607_v0  ;;  %498 = vmatprep.mubr.msk.bf16.mxu1 %vm608_vm0, %v607_v0  ;;  %v537_v6 = vld [vmem:[%s745_s2 + $0x8] sm:$0xff]   ;;  %v532_v7 = vld [vmem:[#allocation2 + $0x20] sm:$0xff]   ;;  %v538_v8 = vld [vmem:[%s745_s2 + $0x10] sm:$0xff]   ;;  %v52_v25 = vshrl.u32 %v51_v24, 7  ;;  %v366_v49 = vand.u32 127, %v51_v24 }
  0x16   :  { %463 = vmatpush3.bf16.msra.mxu0 %v528_v1  ;;  %483 = vmatpush3.bf16.msra.mxu1 %v536_v4  ;;  %v533_v9 = vld [vmem:[#allocation2 + $0x28] sm:$0xff]   ;;  %v539_v10 = vld [vmem:[%s745_s2 + $0x18] sm:$0xff]   ;;  %v534_v11 = vld [vmem:[#allocation2 + $0x30] sm:$0xff]  }
  0x17   :  { %464 = vmatprep.subr.bf16.mxu0 %v607_v0  ;;  %484 = vmatprep.subr.bf16.mxu1 %v607_v0  ;;  %v540_v12 = vld [vmem:[%s745_s2 + $0x20] sm:$0xff]   ;;  %v535_v13 = vld [vmem:[#allocation2 + $0x38] sm:$0xff]   ;;  %v541_v14 = vld [vmem:[%s745_s2 + $0x28] sm:$0xff]   ;;  %v53_v26 = vsub.s32 0, %v52_v25  ;;  %v163_v38 = vsub.s32 1, %v52_v25  ;;  %v274_v47 = vsub.s32 2, %v52_v25 }
  0x18   :  { %v34_v15 = vld [vmem:[%s743_s0] sm:$0xf]  ;;  %v542_v16 = vld [vmem:[%s745_s2 + $0x30] sm:$0xff]   ;;  %v543_v17 = vld [vmem:[%s745_s2 + $0x38] sm:$0xff]   ;;  %vm367_vm1 = vcmp.lt.s32.totalorder %v366_v49, 10 }
  0x19   :  { %v544_v18 = vld [vmem:[%s745_s2 + $0x40] sm:$0xff]   ;;  %v545_v19 = vld [vmem:[%s745_s2 + $0x48] sm:$0xff]   ;;  %v546_v20 = vld [vmem:[%s745_s2 + $0x50] sm:$0xff]  }
  0x1a   :  { %465 = vmatpush3.bf16.msra.mxu0 %v529_v2  ;;  %485 = vmatpush3.bf16.msra.mxu1 %v537_v6  ;;  %v547_v21 = vld [vmem:[%s745_s2 + $0x58] sm:$0xff]   ;;  %v548_v22 = vld [vmem:[%s745_s2 + $0x60] sm:$0xff]   ;;  %v549_v23 = vld [vmem:[%s745_s2 + $0x68] sm:$0xff]  }
  0x1b   :  { %466 = vmatprep.subr.bf16.mxu0 %v607_v0  ;;  %486 = vmatprep.subr.bf16.mxu1 %v607_v0  ;;  %v33_v27 = vld [vmem:[%s746_s3] sm:$0x7]  ;;  %v550_v36 = vld [vmem:[%s745_s2 + $0x70] sm:$0xff]   ;;  %v551_v37 = vld [vmem:[%s745_s2 + $0x78] sm:$0xff]   ;;  %s609_s2 = smov [#allocation5]  }
  0x1c   :  { %v54_v28 = vrot.slane %v33_v27, %v53_v26  ;;  %v164_v39 = vrot.slane %v33_v27, %v163_v38  ;;  %v275_v48 = vrot.slane %v33_v27, %v274_v47  ;;  %s386_s3 = sshll.u32 %s609_s2, 4  ;;  %s387_s3 = int_to_ptr.vmem [resolvable:$true] %s386_s3 }
  0x1d   :  { %s578_s10 = scalar_lea.vmem %s387_s3, 128  ;;  %p583_p9 = scmp.lt.s32.totalorder %s387_s3, %s387_s3 }
  0x1e   :  { %467 = vmatpush3.bf16.msra.mxu0 %v530_v3  ;;  %487 = vmatpush3.bf16.msra.mxu1 %v538_v8  ;;  %p579_p8 = scmp.ne.s32.totalorder %s387_s3, %s578_s10  ;;  %p584_p10 = scmp.lt.s32.totalorder %s578_s10, %s578_s10 }
  0x1f   :  { %468 = vmatprep.subr.bf16.mxu0 %v607_v0  ;;  %488 = vmatprep.subr.bf16.mxu1 %v607_v0 }
  0x20   :  { %p585_p11 = por %p584_p10, %p583_p9 }
  0x22   :  { %469 = vmatpush3.bf16.msra.mxu0 %v531_v5  ;;  %489 = vmatpush3.bf16.msra.mxu1 %v539_v10  ;;  %p586_p12 = pnand %p585_p11, %p579_p8 }
  0x23   :  { %470 = vmatprep.subr.bf16.mxu0 %v607_v0  ;;  %490 = vmatprep.subr.bf16.mxu1 %v607_v0 }
  0x26   :  { %471 = vmatpush3.bf16.msra.mxu0 %v532_v7  ;;  %491 = vmatpush3.bf16.msra.mxu1 %v540_v12 }
  0x27   :  { %472 = vmatprep.subr.bf16.mxu0 %v607_v0  ;;  %492 = vmatprep.subr.bf16.mxu1 %v607_v0 }
  0x2a   :  { %473 = vmatpush3.bf16.msra.mxu0 %v533_v9  ;;  %493 = vmatpush3.bf16.msra.mxu1 %v541_v14 }
  0x2b   :  { %474 = vmatprep.subr.bf16.mxu0 %v607_v0  ;;  %494 = vmatprep.subr.bf16.mxu1 %v607_v0 }
  0x2e   :  { %475 = vmatpush3.bf16.msra.mxu0 %v534_v11  ;;  %495 = vmatpush3.bf16.msra.mxu1 %v542_v16 }
  0x2f   :  { %476 = vmatprep.subr.bf16.mxu0 %v607_v0  ;;  %496 = vmatprep.subr.bf16.mxu1 %v607_v0 }
  0x32   :  { %477 = vmatpush3.bf16.msra.mxu0 %v535_v13  ;;  %497 = vmatpush3.bf16.msra.mxu1 %v543_v17 }
  0x33   :  { %502 = vmatprep.subr.bf16.mxu0 %v607_v0 }
  0x35   :  { %479 = vmatmul.mubr.bf16.vlgmr.msra.gmra.mrb[0].mxu0 %v34_v15 }
  0x36   :  { %518 = vmatprep.mubr.msk.bf16.mxu0 %vm608_vm0, %v607_v0  ;;  %503 = vmatpush3.bf16.msra.mxu0 %v544_v18 }
  0x37   :  { %504 = vmatprep.subr.bf16.mxu0 %v607_v0 }
  0x3a   :  { %505 = vmatpush3.bf16.msra.mxu0 %v545_v19 }
  0x3b   :  { %506 = vmatprep.subr.bf16.mxu0 %v607_v0 }
  0x3e   :  { %507 = vmatpush3.bf16.msra.mxu0 %v546_v20 }
  0x3f   :  { %508 = vmatprep.subr.bf16.mxu0 %v607_v0 }
  0x42   :  { %509 = vmatpush3.bf16.msra.mxu0 %v547_v21 }
  0x43   :  { %510 = vmatprep.subr.bf16.mxu0 %v607_v0 }
  0x46   :  { %511 = vmatpush3.bf16.msra.mxu0 %v548_v22 }
  0x47   :  { %512 = vmatprep.subr.bf16.mxu0 %v607_v0 }
  0x4a   :  { %513 = vmatpush3.bf16.msra.mxu0 %v549_v23 }
  0x4b   :  { %514 = vmatprep.subr.bf16.mxu0 %v607_v0 }
  0x4e   :  { %515 = vmatpush3.bf16.msra.mxu0 %v550_v36 }
  0x4f   :  { %516 = vmatprep.subr.bf16.mxu0 %v607_v0 }
  0x52   :  { %517 = vmatpush3.bf16.msra.mxu0 %v551_v37 }
 0x108   :  { %v137_v29 = vpop.f32.mrb[0].mxu0 }
 0x109   :  { %v138_v30 = vadd.f32 %v137_v29, %v54_v28  ;;  %v480_v31 = vpop.f32.mrb[1].mxu0 }
 0x10a   :  { %v140_v32 = vpop.f32.mrb[2].mxu0 }
 0x10b   :  { %v143_v33 = vmax.f32 %v138_v30, 0.0  ;;  %v481_v34 = vpop.f32.mrb[3].mxu0 }
 0x10d   :  { %v144_v35 = vpack.c.bf16 %v143_v33, %v143_v33 }
 0x10f   :  { %499 = vmatmul.mubr.bf16.vlgmr.msra.gmra.mrb[0].mxu1 %v144_v35 }
 0x1e2   :  { %v247_v40 = vpop.f32.mrb[0].mxu1 }
 0x1e3   :  { %v248_v41 = vadd.f32 %v247_v40, %v164_v39  ;;  %v500_v42 = vpop.f32.mrb[1].mxu1 }
 0x1e4   :  { %v250_v43 = vpop.f32.mrb[2].mxu1 }
 0x1e5   :  { %v253_v44 = vmax.f32 %v248_v41, 0.0  ;;  %v501_v45 = vpop.f32.mrb[3].mxu1 }
 0x1e7   :  { %v254_v46 = vpack.c.bf16 %v253_v44, %v253_v44 }
 0x1e9   :  { %519 = vmatmul.mubr.bf16.vlgmr.msra.gmra.mrb[4].mxu0 %v254_v46 }
 0x2bc   :  { %v358_v50 = vpop.f32.mrb[4].mxu0 }
 0x2bd   :  { %v359_v51 = vadd.f32 %v358_v50, %v275_v48  ;;  %v520_v52 = vpop.f32.mrb[5].mxu0 }
 0x2be   :  { %v361_v53 = vpop.f32.mrb[6].mxu0 }
 0x2bf   :  { %v364_v54 = vmax.f32 %v359_v51, 0.0  ;;  %v521_v55 = vpop.f32.mrb[7].mxu0 }
 0x2c1   :  { %v368_v56 = vsel %vm367_vm1, %v364_v54, -1e+30 }
 0x2c2   :  { %369 = vmax.xlane.f32.xlu0 %v368_v56 }
 0x34f   :  { %v370_v57 = vpop.xlane.xlu0 %369 }
 0x350   :  { %v371_v58 = vsub.f32 %v368_v56, %v370_v57 }
 0x352   :  { %v372_v59 = vmul.f32 1.442695, %v371_v58 }
 0x354   :  { %552 = vpow2.f32 %v372_v59 }
 0x35e   :  { %v553_v60 = vpop.eup %552 }
 0x35f   :  { %374 = vadd.xlane.f32.xlu0 %v553_v60 }
 0x3ec   :  { %v375_v61 = vpop.xlane.xlu0 %374 }
 0x3ed   :  { %554 = vlog2.f32 %v375_v61 }
 0x3f7   :  { %v555_v62 = vpop.eup %554 }
 0x3f8   :  { %v377_v63 = vmul.f32 0.6931472, %v555_v62 }
 0x3fa   :  { %v378_v0 = vsub.f32 %v371_v58, %v377_v63 }
 0x3fc   :  { %379 = vst [vmem:[#allocation5] sm:$0xff] %v378_v0 }
 0x3fd   :  { %589 = shalt.err (!%p586_p12)
}
 0x3fe   :  { %s590_s13 = scalar_lea.hbm %s747_s4, 128 }
 0x3ff   :  { %p591_p13 = scmp.ne.s32.totalorder %s747_s4, %s590_s13  ;;  %p594_p0 = scmp.lt.u32.totalorder %s590_s13, %s747_s4 }
 0x401   :  { %p596_p1 = pnand %p594_p0, %p591_p13 }
 0x403   :  { %599 = shalt.err (!%p596_p1)
}
 0x404   :  { %389 = dma.vmem_to_hbm [thread:$0]  %s387_s3, 128, %s747_s4, [#allocation4]  }
 0x405   :  { %602 = dma.done.wait [#allocation4], 128  }
 0x406   :  { %603 = vsyncadd [#allocation4], 4294967168 }
 0x407   :  { %393 = vsyncpa [#allocation3], 1 }
 0x408   :  { %394 = vsyncpa [#allocation4], 1 }

</bundles_post_ra>
